<compile_context>
chip_gen: v5e
topology: v5e:2x2
jax: 0.10.0
libtpu: 0.0.40
codegen_flags: <defaults>
</compile_context>

<pallas_src>
import functools

import jax
import jax.numpy as jnp
from jax import lax
from jax.experimental import pallas as pl
from jax.experimental.pallas import tpu as pltpu


def _make_kernel(lamda: float, has_noise: bool, tn: int, fold_w: int):
    # Plain Python floats -> inlined literals (NOT captured traced constants).
    lam_half = 0.5 * float(lamda)
    n_fold = tn // fold_w

    def kernel(*refs):
        if has_noise:
            hr_ref, hc_ref, s_ref, nz_ref = refs[:4]
            out_ref, acc_t, acc_p, acc_c = refs[4:]
        else:
            hr_ref, hc_ref, s_ref = refs[:3]
            out_ref, acc_t, acc_p, acc_c = refs[3:]
            nz_ref = None

        j = pl.program_id(1)

        @pl.when(j == 0)
        def _init():
            acc_t[...] = jnp.zeros_like(acc_t)
            acc_p[...] = jnp.zeros_like(acc_p)
            acc_c[...] = jnp.zeros_like(acc_c)

        h = hr_ref[...].astype(jnp.float32)    # (tm, K)  H row tile (unscaled; reused by noise term)
        hc = hc_ref[...].astype(jnp.float32)   # (tn, K)  H "column" tile (rows of H again)
        s = s_ref[...].astype(jnp.float32)     # (tm, tn) similarity tile

        # theta = lamda/2 * H_rows @ H_cols.T   (MXU; contract K of both operands).
        # Fold the scalar into the small (tm, K) operand instead of the (tm, tn) result.
        theta = lax.dot_general(
            h * lam_half, hc, (((1,), (1,)), ((), ())),
            preferred_element_type=jnp.float32)

        # log(1 + exp(-|theta|)) + clamp(theta, min=0) - S * theta
        base = (jnp.log(1.0 + jnp.exp(-jnp.abs(theta)))
                + jnp.maximum(theta, 0.0)
                - s * theta)
        pos = s > 0
        base_pos = jnp.where(pos, base, 0.0)
        cnt = pos.astype(jnp.float32)

        # Lane-fold (tm, tn) -> (tm, fold_w) with static lane-tile-aligned slices:
        # pure VPU adds (vreg selection, no relayout), defers all XLU work to finalize,
        # and keeps accumulator load/store traffic independent of tn.
        def lane_fold(x):
            acc = x[:, 0:fold_w]
            for kk in range(1, n_fold):
                acc = acc + x[:, kk * fold_w:(kk + 1) * fold_w]
            return acc

        acc_t[...] += lane_fold(base)
        acc_p[...] += lane_fold(base_pos)
        acc_c[...] += lane_fold(cnt)

        @pl.when(j == pl.num_programs(1) - 1)
        def _finalize():
            sum_t = jnp.sum(acc_t[...])     # sum of loss over this row block
            sum_p = jnp.sum(acc_p[...])     # sum of loss over S>0 entries
            c_pos = jnp.sum(acc_c[...])     # count(S>0)
            if has_noise:
                noise = jnp.sum(h * nz_ref[...].astype(jnp.float32))
            else:
                noise = 0.0
            # Pack the 4 partials into a lane-aligned (1, 8, 128) block (one row each).
            row = lax.broadcasted_iota(jnp.int32, (8, 128), 0)
            blk = jnp.where(row == 0, sum_t,
                  jnp.where(row == 1, sum_p,
                  jnp.where(row == 2, c_pos,
                  jnp.where(row == 3, noise, 0.0))))
            out_ref[...] = blk[None].astype(jnp.float32)

    return kernel


@functools.partial(jax.jit, static_argnames=("lamda", "beta", "tm", "tn"))
def hashnet_loss_pallas(H, S, noises=None, *, lamda, beta, tm=128, tn=1024):
    N, K = H.shape
    assert S.shape == (N, N)
    has_noise = noises is not None

    tm = min(tm, N)
    tn = min(tn, N)
    assert N % tm == 0 and N % tn == 0, (N, tm, tn)
    # Blocks must be full-extent or (8, 128)-aligned on the last two dims.
    assert tm == N or tm % 8 == 0
    assert tn == N or tn % 128 == 0
    nrb, ncb = N // tm, N // tn

    # Lane width of the in-kernel accumulators: 128 when tn is lane-tile aligned,
    # otherwise fall back to the full (small / full-extent) tile width.
    fold_w = 128 if tn % 128 == 0 else tn

    kernel = _make_kernel(float(lamda), has_noise, tn, fold_w)

    in_specs = [
        pl.BlockSpec((tm, K), lambda i, j: (i, 0)),    # H row tile
        pl.BlockSpec((tn, K), lambda i, j: (j, 0)),    # H column tile (same array, no H.T)
        pl.BlockSpec((tm, tn), lambda i, j: (i, j)),   # S tile (dominant HBM stream)
    ]
    args = [H, H, S]
    if has_noise:
        in_specs.append(pl.BlockSpec((tm, K), lambda i, j: (i, 0)))
        args.append(noises)

    partials = pl.pallas_call(
        kernel,
        out_shape=jax.ShapeDtypeStruct((nrb, 8, 128), jnp.float32),
        grid_spec=pltpu.PrefetchScalarGridSpec(
            num_scalar_prefetch=0,
            grid=(nrb, ncb),
            in_specs=in_specs,
            out_specs=pl.BlockSpec((1, 8, 128), lambda i, j: (i, 0, 0)),
            scratch_shapes=[
                pltpu.VMEM((tm, fold_w), jnp.float32),   # sum(base)
                pltpu.VMEM((tm, fold_w), jnp.float32),   # sum(base * [S>0])
                pltpu.VMEM((tm, fold_w), jnp.float32),   # count(S>0)
            ],
        ),
        compiler_params=pltpu.CompilerParams(
            dimension_semantics=("parallel", "arbitrary"),
        ),
    )(*args)

    # Tiny final combine in plain JAX (4 scalars per row block).
    sum_t = jnp.sum(partials[:, 0, 0])
    sum_p = jnp.sum(partials[:, 1, 0])
    c_pos = jnp.sum(partials[:, 2, 0])
    sum_n = sum_t - sum_p
    c_neg = jnp.float32(N * N) - c_pos
    # mean(loss * masks) == sum_pos / S1 + sum_neg / S0   (since S12 == N*N).
    # Guarded divides: the PyTorch reference would NaN/Inf if a class were empty.
    pos_term = jnp.where(c_pos > 0, sum_p / jnp.maximum(c_pos, 1.0), 0.0)
    neg_term = jnp.where(c_neg > 0, sum_n / jnp.maximum(c_neg, 1.0), 0.0)
    loss = pos_term + neg_term
    if has_noise:
        noise_sum = jnp.sum(partials[:, 3, 0])
        loss = loss - float(beta) * noise_sum / float(N)
    return loss


def hashnet_loss_ref(H, S, noises, lamda, beta):
    """Pure-JAX reference mirroring the PyTorch forward."""
    theta = lamda * (H @ H.T) / 2
    loss = jnp.log(1 + jnp.exp(-jnp.abs(theta))) + jnp.maximum(theta, 0.0) - S * theta
    S1 = jnp.sum(S > 0).astype(jnp.float32)
    S0 = jnp.sum(S <= 0).astype(jnp.float32)
    S12 = S0 + S1
    masks = jnp.where(S > 0, S12 / S1, S12 / S0)
    loss = loss * masks
    if noises is not None:
        return loss.mean() - beta * (H * noises).sum(-1).mean()
    return loss.mean()


if __name__ == "__main__":
    lamda = 1.0
    beta = 0.1

    N, K = 256, 32   # 256 samples, 32-bit hash codes (small but exercises both grid axes)
    key = jax.random.PRNGKey(0)
    k_h, k_n = jax.random.split(key)

    H = jnp.tanh(jax.random.normal(k_h, (N, K), dtype=jnp.float32))
    noises = 0.05 * jax.random.normal(k_n, (N, K), dtype=jnp.float32)

    # Deterministic similarity matrix with both positive and non-positive pairs.
    labels = jnp.arange(N) % 3
    S = (labels[:, None] == labels[None, :]).astype(jnp.float32)

    # 1) Multi-block grid (row AND column tiling exercised), noises provided.
    out = hashnet_loss_pallas(H, S, noises, lamda=lamda, beta=beta, tm=64, tn=128)
    out = jax.block_until_ready(out)
    ref = hashnet_loss_ref(H, S, noises, lamda, beta)
    assert jnp.allclose(out, ref, rtol=5e-4, atol=1e-5), (out, ref)

    # 2) Default tile sizes (clamped to N) and the noises-is-None specialization.
    out_nn = hashnet_loss_pallas(H, S, None, lamda=lamda, beta=beta)
    out_nn = jax.block_until_ready(out_nn)
    ref_nn = hashnet_loss_ref(H, S, None, lamda, beta)
    assert jnp.allclose(out_nn, ref_nn, rtol=5e-4, atol=1e-5), (out_nn, ref_nn)

    # 3) int8 similarity matrix: 4x less HBM traffic for the dominant S stream;
    #    the kernel casts to f32 in VMEM, result is bit-for-bit the same math.
    out_i8 = hashnet_loss_pallas(H, S.astype(jnp.int8), noises, lamda=lamda, beta=beta)
    out_i8 = jax.block_until_ready(out_i8)
    assert jnp.allclose(out_i8, ref, rtol=5e-4, atol=1e-5), (out_i8, ref)

    print("KERNEL_OK")
</pallas_src>

<mosaic_0001>
module attributes {stable_mosaic.version = 11 : i64} {
  func.func @kernel(%arg0: i32, %arg1: i32, %arg2: memref<64x32xf32, #tpu.memory_space<vmem>>, %arg3: memref<128x32xf32, #tpu.memory_space<vmem>>, %arg4: memref<64x128xf32, #tpu.memory_space<vmem>>, %arg5: memref<64x32xf32, #tpu.memory_space<vmem>>, %arg6: memref<1x8x128xf32, #tpu.memory_space<vmem>>, %arg7: memref<64x128xf32, #tpu.memory_space<vmem>>, %arg8: memref<64x128xf32, #tpu.memory_space<vmem>>, %arg9: memref<64x128xf32, #tpu.memory_space<vmem>>) attributes {dimension_semantics = [#tpu.dimension_semantics<parallel>, #tpu.dimension_semantics<arbitrary>], iteration_bounds = array<i64: 4, 2>, scalar_prefetch = 0 : i64, scratch_operands = 3 : i64, tpu.core_type = #tpu.core_type<tc>, window_params = [{transform_indices = @transform_0, window_bounds = array<i64: 64, 32>}, {transform_indices = @transform_1, window_bounds = array<i64: 128, 32>}, {transform_indices = @transform_2, window_bounds = array<i64: 64, 128>}, {transform_indices = @transform_3, window_bounds = array<i64: 64, 32>}, {transform_indices = @transform_4, window_bounds = array<i64: 1, 8, 128>}]} {
    %c0_i32 = arith.constant 0 : i32
    %0 = arith.cmpi eq, %arg1, %c0_i32 : i32
    %1 = arith.extui %0 : i1 to i32
    %c0_i32_0 = arith.constant 0 : i32
    %2 = arith.cmpi ne, %1, %c0_i32_0 : i32
    scf.if %2 {
      %cst_25 = arith.constant 0.000000e+00 : f32
      %39 = vector.broadcast %cst_25 : f32 to vector<64x128xf32>
      %c0_26 = arith.constant 0 : index
      %c0_27 = arith.constant 0 : index
      %40 = vector.load %arg7[%c0_26, %c0_27] : memref<64x128xf32, #tpu.memory_space<vmem>>, vector<64x128xf32>
      tpu.vector_store %arg7[%c0_26, %c0_27], %39 {strides = array<i32>} : memref<64x128xf32, #tpu.memory_space<vmem>>, vector<64x128xf32>,
      %cst_28 = arith.constant 0.000000e+00 : f32
      %41 = vector.broadcast %cst_28 : f32 to vector<64x128xf32>
      %c0_29 = arith.constant 0 : index
      %c0_30 = arith.constant 0 : index
      %42 = vector.load %arg8[%c0_29, %c0_30] : memref<64x128xf32, #tpu.memory_space<vmem>>, vector<64x128xf32>
      tpu.vector_store %arg8[%c0_29, %c0_30], %41 {strides = array<i32>} : memref<64x128xf32, #tpu.memory_space<vmem>>, vector<64x128xf32>,
      %cst_31 = arith.constant 0.000000e+00 : f32
      %43 = vector.broadcast %cst_31 : f32 to vector<64x128xf32>
      %c0_32 = arith.constant 0 : index
      %c0_33 = arith.constant 0 : index
      %44 = vector.load %arg9[%c0_32, %c0_33] : memref<64x128xf32, #tpu.memory_space<vmem>>, vector<64x128xf32>
      tpu.vector_store %arg9[%c0_32, %c0_33], %43 {strides = array<i32>} : memref<64x128xf32, #tpu.memory_space<vmem>>, vector<64x128xf32>,
    } else {
    }
    %c0 = arith.constant 0 : index
    %c0_1 = arith.constant 0 : index
    %3 = vector.load %arg2[%c0, %c0_1] : memref<64x32xf32, #tpu.memory_space<vmem>>, vector<64x32xf32>
    %c0_2 = arith.constant 0 : index
    %c0_3 = arith.constant 0 : index
    %4 = vector.load %arg3[%c0_2, %c0_3] : memref<128x32xf32, #tpu.memory_space<vmem>>, vector<128x32xf32>
    %c0_4 = arith.constant 0 : index
    %c0_5 = arith.constant 0 : index
    %5 = vector.load %arg4[%c0_4, %c0_5] : memref<64x128xf32, #tpu.memory_space<vmem>>, vector<64x128xf32>
    %cst = arith.constant 5.000000e-01 : f32
    %6 = vector.broadcast %cst : f32 to vector<64x32xf32>
    %7 = arith.mulf %3, %6 : vector<64x32xf32>
    %cst_6 = arith.constant dense<0.000000e+00> : vector<64x128xf32>
    %8 = tpu.matmul %7, %4, %cst_6 {dimension_numbers = #tpu.dot_dimension_numbers<[1], [1], [0], [0], [0, 0, 1, 0], [], []>} : vector<64x32xf32>, vector<128x32xf32>, vector<64x128xf32> -> vector<64x128xf32>
    %9 = math.absf %8 : vector<64x128xf32>
    %cst_7 = arith.constant 0.000000e+00 : f32
    %10 = vector.broadcast %cst_7 : f32 to vector<64x128xf32>
    %11 = arith.subf %10, %9 : vector<64x128xf32>
    %12 = math.exp %11 : vector<64x128xf32>
    %cst_8 = arith.constant 1.000000e+00 : f32
    %13 = vector.broadcast %cst_8 : f32 to vector<64x128xf32>
    %14 = arith.addf %13, %12 : vector<64x128xf32>
    %15 = math.log %14 : vector<64x128xf32>
    %cst_9 = arith.constant 0.000000e+00 : f32
    %16 = vector.broadcast %cst_9 : f32 to vector<64x128xf32>
    %17 = arith.maximumf %8, %16 : vector<64x128xf32>
    %18 = arith.addf %15, %17 : vector<64x128xf32>
    %19 = arith.mulf %5, %8 : vector<64x128xf32>
    %20 = arith.subf %18, %19 : vector<64x128xf32>
    %cst_10 = arith.constant 0.000000e+00 : f32
    %21 = vector.broadcast %cst_10 : f32 to vector<64x128xf32>
    %22 = arith.cmpf ogt, %5, %21 : vector<64x128xf32>
    %cst_11 = arith.constant 0.000000e+00 : f32
    %23 = vector.broadcast %cst_11 : f32 to vector<64x128xf32>
    %24 = arith.select %22, %20, %23 : vector<64x128xi1>, vector<64x128xf32>
    %25 = arith.extui %22 : vector<64x128xi1> to vector<64x128xi32>
    %26 = arith.sitofp %25 : vector<64x128xi32> to vector<64x128xf32>
    %c0_12 = arith.constant 0 : index
    %c0_13 = arith.constant 0 : index
    %27 = vector.load %arg7[%c0_12, %c0_13] : memref<64x128xf32, #tpu.memory_space<vmem>>, vector<64x128xf32>
    %28 = arith.addf %27, %20 : vector<64x128xf32>
    %c0_14 = arith.constant 0 : index
    %c0_15 = arith.constant 0 : index
    %29 = vector.load %arg7[%c0_14, %c0_15] : memref<64x128xf32, #tpu.memory_space<vmem>>, vector<64x128xf32>
    tpu.vector_store %arg7[%c0_14, %c0_15], %28 {strides = array<i32>} : memref<64x128xf32, #tpu.memory_space<vmem>>, vector<64x128xf32>,
    %c0_16 = arith.constant 0 : index
    %c0_17 = arith.constant 0 : index
    %30 = vector.load %arg8[%c0_16, %c0_17] : memref<64x128xf32, #tpu.memory_space<vmem>>, vector<64x128xf32>
    %31 = arith.addf %30, %24 : vector<64x128xf32>
    %c0_18 = arith.constant 0 : index
    %c0_19 = arith.constant 0 : index
    %32 = vector.load %arg8[%c0_18, %c0_19] : memref<64x128xf32, #tpu.memory_space<vmem>>, vector<64x128xf32>
    tpu.vector_store %arg8[%c0_18, %c0_19], %31 {strides = array<i32>} : memref<64x128xf32, #tpu.memory_space<vmem>>, vector<64x128xf32>,
    %c0_20 = arith.constant 0 : index
    %c0_21 = arith.constant 0 : index
    %33 = vector.load %arg9[%c0_20, %c0_21] : memref<64x128xf32, #tpu.memory_space<vmem>>, vector<64x128xf32>
    %34 = arith.addf %33, %26 : vector<64x128xf32>
    %c0_22 = arith.constant 0 : index
    %c0_23 = arith.constant 0 : index
    %35 = vector.load %arg9[%c0_22, %c0_23] : memref<64x128xf32, #tpu.memory_space<vmem>>, vector<64x128xf32>
    tpu.vector_store %arg9[%c0_22, %c0_23], %34 {strides = array<i32>} : memref<64x128xf32, #tpu.memory_space<vmem>>, vector<64x128xf32>,
    %c1_i32 = arith.constant 1 : i32
    %36 = arith.cmpi eq, %arg1, %c1_i32 : i32
    %37 = arith.extui %36 : i1 to i32
    %c0_i32_24 = arith.constant 0 : i32
    %38 = arith.cmpi ne, %37, %c0_i32_24 : i32
    scf.if %38 {
      %c0_25 = arith.constant 0 : index
      %c0_26 = arith.constant 0 : index
      %39 = vector.load %arg7[%c0_25, %c0_26] : memref<64x128xf32, #tpu.memory_space<vmem>>, vector<64x128xf32>
      %40 = vector.shape_cast %39 : vector<64x128xf32> to vector<1x64x128xf32>
      %cst_27 = arith.constant dense<0.000000e+00> : vector<1xf32>
      %41 = vector.multi_reduction <add>, %40, %cst_27 [1, 2] : vector<1x64x128xf32> to vector<1xf32>
      %42 = vector.shape_cast %41 : vector<1xf32> to vector<1x1x1xf32>
      %43 = vector.extract %42[0, 0, 0] : f32 from vector<1x1x1xf32>
      %c0_28 = arith.constant 0 : index
      %c0_29 = arith.constant 0 : index
      %44 = vector.load %arg8[%c0_28, %c0_29] : memref<64x128xf32, #tpu.memory_space<vmem>>, vector<64x128xf32>
      %45 = vector.shape_cast %44 : vector<64x128xf32> to vector<1x64x128xf32>
      %cst_30 = arith.constant dense<0.000000e+00> : vector<1xf32>
      %46 = vector.multi_reduction <add>, %45, %cst_30 [1, 2] : vector<1x64x128xf32> to vector<1xf32>
      %47 = vector.shape_cast %46 : vector<1xf32> to vector<1x1x1xf32>
      %48 = vector.extract %47[0, 0, 0] : f32 from vector<1x1x1xf32>
      %c0_31 = arith.constant 0 : index
      %c0_32 = arith.constant 0 : index
      %49 = vector.load %arg9[%c0_31, %c0_32] : memref<64x128xf32, #tpu.memory_space<vmem>>, vector<64x128xf32>
      %50 = vector.shape_cast %49 : vector<64x128xf32> to vector<1x64x128xf32>
      %cst_33 = arith.constant dense<0.000000e+00> : vector<1xf32>
      %51 = vector.multi_reduction <add>, %50, %cst_33 [1, 2] : vector<1x64x128xf32> to vector<1xf32>
      %52 = vector.shape_cast %51 : vector<1xf32> to vector<1x1x1xf32>
      %53 = vector.extract %52[0, 0, 0] : f32 from vector<1x1x1xf32>
      %c0_34 = arith.constant 0 : index
      %c0_35 = arith.constant 0 : index
      %54 = vector.load %arg5[%c0_34, %c0_35] : memref<64x32xf32, #tpu.memory_space<vmem>>, vector<64x32xf32>
      %55 = arith.mulf %3, %54 : vector<64x32xf32>
      %56 = vector.shape_cast %55 : vector<64x32xf32> to vector<1x64x32xf32>
      %cst_36 = arith.constant dense<0.000000e+00> : vector<1xf32>
      %57 = vector.multi_reduction <add>, %56, %cst_36 [1, 2] : vector<1x64x32xf32> to vector<1xf32>
      %58 = vector.shape_cast %57 : vector<1xf32> to vector<1x1x1xf32>
      %59 = vector.extract %58[0, 0, 0] : f32 from vector<1x1x1xf32>
      %60 = tpu.iota {dimensions = array<i32: 0>} : vector<8x128xi32>
      %c0_i32_37 = arith.constant 0 : i32
      %61 = vector.broadcast %c0_i32_37 : i32 to vector<8x128xi32>
      %62 = arith.cmpi eq, %60, %61 : vector<8x128xi32>
      %c1_i32_38 = arith.constant 1 : i32
      %63 = vector.broadcast %c1_i32_38 : i32 to vector<8x128xi32>
      %64 = arith.cmpi eq, %60, %63 : vector<8x128xi32>
      %c2_i32 = arith.constant 2 : i32
      %65 = vector.broadcast %c2_i32 : i32 to vector<8x128xi32>
      %66 = arith.cmpi eq, %60, %65 : vector<8x128xi32>
      %c3_i32 = arith.constant 3 : i32
      %67 = vector.broadcast %c3_i32 : i32 to vector<8x128xi32>
      %68 = arith.cmpi eq, %60, %67 : vector<8x128xi32>
      %cst_39 = arith.constant 0.000000e+00 : f32
      %69 = vector.broadcast %59 : f32 to vector<8x128xf32>
      %70 = vector.broadcast %cst_39 : f32 to vector<8x128xf32>
      %71 = arith.select %68, %69, %70 : vector<8x128xi1>, vector<8x128xf32>
      %72 = vector.broadcast %53 : f32 to vector<8x128xf32>
      %73 = arith.select %66, %72, %71 : vector<8x128xi1>, vector<8x128xf32>
      %74 = vector.broadcast %48 : f32 to vector<8x128xf32>
      %75 = arith.select %64, %74, %73 : vector<8x128xi1>, vector<8x128xf32>
      %76 = vector.broadcast %43 : f32 to vector<8x128xf32>
      %77 = arith.select %62, %76, %75 : vector<8x128xi1>, vector<8x128xf32>
      %78 = vector.shape_cast %77 : vector<8x128xf32> to vector<1x8x128xf32>
      %c0_40 = arith.constant 0 : index
      %c0_41 = arith.constant 0 : index
      %c0_42 = arith.constant 0 : index
      %79 = vector.load %arg6[%c0_40, %c0_41, %c0_42] : memref<1x8x128xf32, #tpu.memory_space<vmem>>, vector<1x8x128xf32>
      tpu.vector_store %arg6[%c0_40, %c0_41, %c0_42], %78 {strides = array<i32>} : memref<1x8x128xf32, #tpu.memory_space<vmem>>, vector<1x8x128xf32>,
    } else {
    }
    return
  }
  func.func @transform_0(%arg0: i32, %arg1: i32) -> (i32, i32) {
    %c0_i32 = arith.constant 0 : i32
    %c0_i32_0 = arith.constant 0 : i32
    return %arg0, %c0_i32 : i32, i32
  }
  func.func @transform_1(%arg0: i32, %arg1: i32) -> (i32, i32) {
    %c0_i32 = arith.constant 0 : i32
    %c0_i32_0 = arith.constant 0 : i32
    return %arg1, %c0_i32 : i32, i32
  }
  func.func @transform_2(%arg0: i32, %arg1: i32) -> (i32, i32) {
    %c0_i32 = arith.constant 0 : i32
    return %arg0, %arg1 : i32, i32
  }
  func.func @transform_3(%arg0: i32, %arg1: i32) -> (i32, i32) {
    %c0_i32 = arith.constant 0 : i32
    %c0_i32_0 = arith.constant 0 : i32
    return %arg0, %c0_i32 : i32, i32
  }
  func.func @transform_4(%arg0: i32, %arg1: i32) -> (i32, i32, i32) {
    %c0_i32 = arith.constant 0 : i32
    %c0_i32_0 = arith.constant 0 : i32
    %c0_i32_1 = arith.constant 0 : i32
    return %arg0, %c0_i32, %c0_i32_0 : i32, i32, i32
  }
}

</mosaic_0001>

<bundles_post_ra>
// kernel: hashnet_loss_pallas.1
= control target key start
LH: loop header
LB: loop body
LE: loop exit
PB: predicated region body
PF: predicated region fallthrough
CT: control target
= control target key end

     0   :  { %s1239_s15 = smov 0   ;;  %s1241_s16 = smov 0   ;;  %s1616_s0 = inlined_call_operand.vmem [shape: f32[256,32], index: 0, kind: input, shape index: {}, may-alias: {0,1}]   ;;  %s1617_s1 = inlined_call_operand.vmem [shape: f32[256,32], index: 1, kind: input, shape index: {}, may-alias: {0,1}]   ;;  %s1618_s2 = inlined_call_operand.vmem [shape: f32[256,256], index: 2, kind: input, shape index: {}]   ;;  %s1619_s3 = inlined_call_operand.vmem [shape: f32[256,32], index: 3, kind: input, shape index: {}]   ;;  %s1620_s4 = inlined_call_operand.vmem [shape: f32[4,8,128], index: 4, kind: output, shape index: {}]  }
   0x1   :  { %s1243_s17 = smov 0   ;;  %s1245_s18 = smov 0  }
   0x2   :  { %s1247_s19 = smov 0   ;;  %s1249_s20 = smov 0  }
   0x3   :  { %s1251_s21 = smov 0  }
   0x4 LB: > { %s23_s22 = sadd.s32 1, %s1202_s19  ;;  %s26_s23 = sadd.s32 1, %s1206_s20  ;;  %s1210_s21 = sphi %s1251_s21, %s14_s21   ;;  %s1206_s20 = sphi %s1249_s20, %s1626_s20   ;;  %s1202_s19 = sphi %s1247_s19, %s1625_s19   ;;  %s1198_s18 = sphi %s1245_s18, %s1624_s18   ;;  %s1194_s17 = sphi %s1243_s17, %s1623_s17   ;;  %s1190_s16 = sphi %s1241_s16, %s1622_s16   ;;  %s1186_s15 = sphi %s1239_s15, %s1621_s15  }
   0x5   : > { %p24_p0 = scmp.ge.s32.totalorder %s23_s22, 2  ;;  %p94_p1 = scmp.ne.s32.totalorder %s1190_s16, %s1186_s15 }
   0x6   : > { %p95_p2 = scmp.eq.s32.totalorder %s1210_s21, 0  ;;  %s87_s27 = sadd.s32 1, %s1190_s16 }
   0x7   : > { %s1628_s22 = smov (%p24_p0, %s23_s22), 0  ;;  %s1630_s23 = smov (!%p24_p0, %s26_s23), %s1206_s20 }
   0x8   : > { %p96_p3 = por %p95_p2, %p94_p1  ;;  %p28_p4 = scmp.ge.s32.totalorder %s1630_s23, 4 }
   0x9   : > { %s83_s24 = ssub.s32 %s1202_s19, %s1628_s22  ;;  %p959_p6 = scmp.ge.s32.totalorder %s1210_s21, 8 }
   0xa   : > { %s1632_s23 = smov (%p28_p4, %s1630_s23), 0 }
   0xb   : > { %s82_s25 = ssub.s32 %s1206_s20, %s1632_s23  ;;  %172 = sbr.rel (%p959_p6) target bundleno = 30 (0x1e), region = 16 }
   0xc   : > { %s84_s26 = sor.u32 %s83_s24, %s82_s25 }
   0xd   : > { %p85_p5 = scmp.eq.s32.totalorder %s84_s26, 0 }
   0xf   : > { %s1290_s28 = scalar_select %p85_p5, %s1190_s16, %s87_s27  }
  0x10   : > { %193 = sbr.rel (!%p96_p3) target bundleno = 30 (0x1e), region = 28  ;;  %s195_s29 = sand.u32 (%p96_p3), 1, %s1190_s16  }
  0x11   : > { %s1009_s30 = sshll.u32 (%p96_p3), %s1206_s20, 4  ;;  %s960_s5 = sshll.u32 (%p96_p3), %s195_s29, 6 }
  0x12   : > { %s200_s6 = sadd.s32 (%p96_p3), %s1202_s19, %s1009_s30  ;;  %s197_s11 = scalar_lea.vmem (%p96_p3), [#allocation5], %s960_s5 }
  0x13   : > { %s963_s7 = sshll.u32 (%p96_p3), %s200_s6, 3 }
  0x14   : > { %s202_s10 = scalar_lea.vmem (%p96_p3), %s1618_s2, %s963_s7 }
  0x15   : > { %v245_v0 = vld [vmem:[%s202_s10] sm:$0xff]  ;;  %v247_v1 = vld [vmem:[%s202_s10 + $0x10] sm:$0xff] }
  0x16   : > { %v249_v2 = vld [vmem:[%s202_s10 + $0x20] sm:$0xff]  ;;  %246 = vst [vmem:[%s197_s11] sm:$0xff] %v245_v0  ;;  %v251_v3 = vld [vmem:[%s202_s10 + $0x30] sm:$0xff] }
  0x17   : > { %248 = vst [vmem:[%s197_s11 + $0x8] sm:$0xff] %v247_v1  ;;  %v253_v4 = vld [vmem:[%s202_s10 + $0x40] sm:$0xff]  ;;  %v255_v5 = vld [vmem:[%s202_s10 + $0x50] sm:$0xff] }
  0x18   : > { %250 = vst [vmem:[%s197_s11 + $0x10] sm:$0xff] %v249_v2  ;;  %v257_v6 = vld [vmem:[%s202_s10 + $0x60] sm:$0xff]  ;;  %v259_v7 = vld [vmem:[%s202_s10 + $0x70] sm:$0xff] }
  0x19   : > { %252 = vst [vmem:[%s197_s11 + $0x18] sm:$0xff] %v251_v3 }
  0x1a   : > { %254 = vst [vmem:[%s197_s11 + $0x20] sm:$0xff] %v253_v4 }
  0x1b   : > { %256 = vst [vmem:[%s197_s11 + $0x28] sm:$0xff] %v255_v5 }
  0x1c   : > { %258 = vst [vmem:[%s197_s11 + $0x30] sm:$0xff] %v257_v6 }
  0x1d   : > { %260 = vst [vmem:[%s197_s11 + $0x38] sm:$0xff] %v259_v7 }
  0x1e PF: > { %p964_p7 = scmp.ge.s32.totalorder %s1210_s21, 1  ;;  %p274_p8 = scmp.lt.s32.totalorder %s1210_s21, 9 }
  0x20   : > { %p275_p9 = pnand %p964_p7, %p274_p8 }
  0x21   : > { %s281_s12 = sand.u32 (!%p275_p9), 1, %s1186_s15   ;;  %s966_s13 = sshll.u32 (!%p275_p9), %s1198_s18, 3 }
  0x22   : > { %278 = sbr.rel (%p275_p9) target bundleno = 525 (0x20d), region = 70  ;;  %s965_s14 = sshll.u32 (!%p275_p9), %s281_s12, 6 }
  0x23   : > { %p321_p10 = scmp.lt.s32.totalorder (!%p275_p9), %s966_s13, 31  ;;  %s968_s24 = sshll.u32 (!%p275_p9), %s1194_s17, 4 }
  0x24   : > { %p327_p11 = scmp.lt.s32.totalorder (!%p275_p9), %s968_s24, 31  ;;  %p339_p12 = scmp.lt.s32.totalorder (!%p275_p9), %s1198_s18, 3 }
  0x25   : > { %s1326_s26 = scalar_lea.vmem (!%p275_p9), [#allocation5], %s965_s14  ;;  %p973_p13 = scmp.ne.s32.totalorder (!%p275_p9), %s1194_s17, 0 }
  0x27   : > { %s1634_s13 = smov (!%p321_p10, %s966_s13), 31  ;;  %s1636_s24 = smov (!%p327_p11, %s968_s24), 31 }
  0x28   : > { %s967_s25 = sshll.u32 %s1634_s13, 3  ;;  %s1638_s18 = smov (!%p339_p12, %s1198_s18), 3 }
  0x29   : > { %s1308_s29 = scalar_lea.vmem %s1616_s0, %s967_s25  ;;  %s1313_s6 = scalar_lea.vmem %s1619_s3, %s967_s25 }
  0x2a   : > { %s969_s15 = sshll.u32 %s1636_s24, 3  ;;  %s972_s10 = sshll.u32 %s1638_s18, 3 }
  0x2b   : > { %s1319_s9 = scalar_lea.vmem %s1617_s1, %s969_s15  ;;  %s1324_s13 = scalar_lea.vmem %s1620_s4, %s972_s10 }
  0x2c   : > { %346 = sbr.rel (%p973_p13) target bundleno = 74 (0x4a), region = 78 }
  0x31   : > { %v1212_v8 = vmov 0.0  }
  0x32   : > { %347 = vst [vmem:[#allocation2 + $0x30] sm:$0xff] %v1212_v8 }
  0x33   : > { %348 = vst [vmem:[#allocation2] sm:$0xff] %v1212_v8 }
  0x34   : > { %349 = vst [vmem:[#allocation2 + $0x18] sm:$0xff] %v1212_v8 }
  0x35   : > { %350 = vst [vmem:[#allocation2 + $0x10] sm:$0xff] %v1212_v8 }
  0x36   : > { %351 = vst [vmem:[#allocation2 + $0x8] sm:$0xff] %v1212_v8 }
  0x37   : > { %352 = vst [vmem:[#allocation2 + $0x20] sm:$0xff] %v1212_v8 }
  0x38   : > { %353 = vst [vmem:[#allocation2 + $0x28] sm:$0xff] %v1212_v8 }
  0x39   : > { %354 = vst [vmem:[#allocation2 + $0x38] sm:$0xff] %v1212_v8 }
  0x3a   : > { %355 = vst [vmem:[#allocation3] sm:$0xff] %v1212_v8 }
  0x3b   : > { %356 = vst [vmem:[#allocation3 + $0x18] sm:$0xff] %v1212_v8 }
  0x3c   : > { %357 = vst [vmem:[#allocation3 + $0x10] sm:$0xff] %v1212_v8 }
  0x3d   : > { %358 = vst [vmem:[#allocation3 + $0x20] sm:$0xff] %v1212_v8 }
  0x3e   : > { %359 = vst [vmem:[#allocation3 + $0x28] sm:$0xff] %v1212_v8 }
  0x3f   : > { %360 = vst [vmem:[#allocation3 + $0x8] sm:$0xff] %v1212_v8 }
  0x40   : > { %361 = vst [vmem:[#allocation3 + $0x30] sm:$0xff] %v1212_v8 }
  0x41   : > { %362 = vst [vmem:[#allocation3 + $0x38] sm:$0xff] %v1212_v8 }
  0x42   : > { %363 = vst [vmem:[#allocation4 + $0x28] sm:$0xff] %v1212_v8 }
  0x43   : > { %364 = vst [vmem:[#allocation4 + $0x20] sm:$0xff] %v1212_v8 }
  0x44   : > { %365 = vst [vmem:[#allocation4 + $0x38] sm:$0xff] %v1212_v8 }
  0x45   : > { %366 = vst [vmem:[#allocation4 + $0x10] sm:$0xff] %v1212_v8 }
  0x46   : > { %367 = vst [vmem:[#allocation4 + $0x8] sm:$0xff] %v1212_v8 }
  0x47   : > { %368 = vst [vmem:[#allocation4 + $0x30] sm:$0xff] %v1212_v8 }
  0x48   : > { %369 = vst [vmem:[#allocation4 + $0x18] sm:$0xff] %v1212_v8 }
  0x49   : > { %370 = vst [vmem:[#allocation4] sm:$0xff] %v1212_v8 }
  0x4a PF: > { %v394_v9 = vld [vmem:[%s1319_s9 + $0x78] sm:$0xff]  ;;  %vm411_vm0 = vcmask 261120   ;;  %v393_v10 = vld [vmem:[%s1319_s9 + $0x70] sm:$0xff]  ;;  %v392_v11 = vld [vmem:[%s1319_s9 + $0x68] sm:$0xff]  ;;  %v1213_v42 = vmov 0.0   ;;  %p1006_p0 = scmp.ne.s32.totalorder %s1194_s17, 1 }
  0x4b   : > { %974 = vmatpush.xpose.msk.msra.mxu0 %vm411_vm0, %v394_v9  ;;  %1010 = vmatpush.xpose.msk.msra.mxu1 %vm411_vm0, %v394_v9  ;;  %v391_v12 = vld [vmem:[%s1319_s9 + $0x60] sm:$0xff]  ;;  %v390_v13 = vld [vmem:[%s1319_s9 + $0x58] sm:$0xff]  ;;  %v389_v14 = vld [vmem:[%s1319_s9 + $0x50] sm:$0xff] }
  0x4c   : > { %1011 = vmatpush.xpose.msk.msra.mxu2 %vm411_vm0, %v394_v9  ;;  %1012 = vmatpush.xpose.msk.msra.mxu3 %vm411_vm0, %v394_v9  ;;  %v388_v15 = vld [vmem:[%s1319_s9 + $0x48] sm:$0xff]  ;;  %v387_v16 = vld [vmem:[%s1319_s9 + $0x40] sm:$0xff]  ;;  %v386_v17 = vld [vmem:[%s1319_s9 + $0x38] sm:$0xff] }
  0x4d   : > { %v385_v18 = vld [vmem:[%s1319_s9 + $0x30] sm:$0xff]  ;;  %v384_v19 = vld [vmem:[%s1319_s9 + $0x28] sm:$0xff]  ;;  %v383_v20 = vld [vmem:[%s1319_s9 + $0x20] sm:$0xff] }
  0x4e   : > { %v382_v21 = vld [vmem:[%s1319_s9 + $0x18] sm:$0xff]  ;;  %v381_v22 = vld [vmem:[%s1319_s9 + $0x10] sm:$0xff]  ;;  %v380_v23 = vld [vmem:[%s1319_s9 + $0x8] sm:$0xff] }
  0x4f   : > { %975 = vmatpush.xpose.msk.msra.mxu0 %vm411_vm0, %v393_v10  ;;  %1013 = vmatpush.xpose.msk.msra.mxu1 %vm411_vm0, %v393_v10  ;;  %v1403_v24 = vld [vmem:[%s1308_s29] sm:$0xff]  ;;  %v1406_v25 = vld [vmem:[%s1308_s29 + $0x10] sm:$0xff]  ;;  %v1430_v33 = vld [vmem:[%s1308_s29 + $0x8] sm:$0xff] }
  0x50   : > { %1014 = vmatpush.xpose.msk.msra.mxu2 %vm411_vm0, %v393_v10  ;;  %1015 = vmatpush.xpose.msk.msra.mxu3 %vm411_vm0, %v393_v10  ;;  %v379_v26 = vld [vmem:[%s1319_s9] sm:$0xff]  ;;  %v1415_v28 = vld [vmem:[%s1308_s29 + $0x30] sm:$0xff]  ;;  %v403_v29 = vmul.f32 0.5, %v1403_v24  ;;  %v405_v30 = vmul.f32 0.5, %v1406_v25  ;;  %v1433_v34 = vld [vmem:[%s1308_s29 + $0x18] sm:$0xff]  ;;  %v404_v37 = vmul.f32 0.5, %v1430_v33 }
  0x51   : > { %v1412_v27 = vld [vmem:[%s1308_s29 + $0x20] sm:$0xff]  ;;  %v409_v32 = vmul.f32 0.5, %v1415_v28  ;;  %v1436_v35 = vld [vmem:[%s1308_s29 + $0x28] sm:$0xff]  ;;  %v1439_v36 = vld [vmem:[%s1308_s29 + $0x38] sm:$0xff]  ;;  %v406_v38 = vmul.f32 0.5, %v1433_v34 }
  0x52   : > { %v407_v31 = vmul.f32 0.5, %v1412_v27  ;;  %v408_v39 = vmul.f32 0.5, %v1436_v35  ;;  %v410_v40 = vmul.f32 0.5, %v1439_v36  ;;  %v1450_v41 = vld [vmem:[%s1326_s26] sm:$0xff]  ;;  %v1457_v44 = vld [vmem:[%s1326_s26 + $0x10] sm:$0xff]  ;;  %v693_v46 = vld [vmem:[#allocation4 + $0x28] sm:$0xff] }
  0x53   : > { %976 = vmatpush.xpose.msk.msra.mxu0 %vm411_vm0, %v392_v11  ;;  %1016 = vmatpush.xpose.msk.msra.mxu1 %vm411_vm0, %v392_v11  ;;  %vm613_vm1 = vcmp.gt.f32.partialorder %v1450_v41, 0.0  ;;  %vm615_vm2 = vcmp.gt.f32.partialorder %v1457_v44, 0.0  ;;  %v695_v52 = vld [vmem:[#allocation4 + $0x38] sm:$0xff]  ;;  %v1470_v56 = vld [vmem:[%s1326_s26 + $0x20] sm:$0xff]  ;;  %v1474_v58 = vld [vmem:[%s1326_s26 + $0x30] sm:$0xff] }
  0x54   : > { %1017 = vmatpush.xpose.msk.msra.mxu2 %vm411_vm0, %v392_v11  ;;  %1018 = vmatpush.xpose.msk.msra.mxu3 %vm411_vm0, %v392_v11  ;;  %v998_v43 = vsel %vm613_vm1, 1.0, %v1213_v42  ;;  %v1000_v48 = vsel %vm615_vm2, 1.0, %v1213_v42  ;;  %vm617_vm3 = vcmp.gt.f32.partialorder %v1470_v56, 0.0  ;;  %vm619_vm4 = vcmp.gt.f32.partialorder %v1474_v58, 0.0  ;;  %v697_v62 = vld [vmem:[#allocation4 + $0x8] sm:$0xff]  ;;  %v699_v6 = vld [vmem:[#allocation4 + $0x18] sm:$0xff] }
  0x55   : > { %v701_v50 = vadd.f32 %v998_v43, %v693_v46  ;;  %v703_v54 = vadd.f32 %v1000_v48, %v695_v52  ;;  %v1002_v60 = vsel %vm617_vm3, 1.0, %v1213_v42  ;;  %v1004_v0 = vsel %vm619_vm4, 1.0, %v1213_v42  ;;  %v1494_v7 = vld [vmem:[%s1326_s26 + $0x8] sm:$0xff]  ;;  %v698_v46 = vld [vmem:[#allocation4 + $0x30] sm:$0xff]  ;;  %v700_v52 = vld [vmem:[#allocation4] sm:$0xff] }
  0x56   : > { %v705_v4 = vadd.f32 %v1002_v60, %v697_v62  ;;  %v707_v9 = vadd.f32 %v1004_v0, %v699_v6  ;;  %vm614_vm5 = vcmp.gt.f32.partialorder %v1494_v7, 0.0 }
  0x57   : > { %977 = vmatpush.xpose.msk.msra.mxu0 %vm411_vm0, %v391_v12  ;;  %1019 = vmatpush.xpose.msk.msra.mxu1 %vm411_vm0, %v391_v12  ;;  %709 = vst [vmem:[#allocation4 + $0x28] sm:$0xff] %v701_v50 }
  0x58   : > { %1020 = vmatpush.xpose.msk.msra.mxu2 %vm411_vm0, %v391_v12  ;;  %1021 = vmatpush.xpose.msk.msra.mxu3 %vm411_vm0, %v391_v12  ;;  %711 = vst [vmem:[#allocation4 + $0x38] sm:$0xff] %v703_v54  ;;  %v999_v12 = vsel %vm614_vm5, 1.0, %v1213_v42 }
  0x59   : > { %713 = vst [vmem:[#allocation4 + $0x8] sm:$0xff] %v705_v4 }
  0x5a   : > { %715 = vst [vmem:[#allocation4 + $0x18] sm:$0xff] %v707_v9 }
  0x5b   : > { %978 = vmatpush.xpose.msk.msra.mxu0 %vm411_vm0, %v390_v13  ;;  %1022 = vmatpush.xpose.msk.msra.mxu1 %vm411_vm0, %v390_v13 }
  0x5c   : > { %1023 = vmatpush.xpose.msk.msra.mxu2 %vm411_vm0, %v390_v13  ;;  %1024 = vmatpush.xpose.msk.msra.mxu3 %vm411_vm0, %v390_v13  ;;  %v694_v13 = vld [vmem:[#allocation4 + $0x20] sm:$0xff] }
  0x5f   : > { %979 = vmatpush.xpose.msk.msra.mxu0 %vm411_vm0, %v389_v14  ;;  %1025 = vmatpush.xpose.msk.msra.mxu1 %vm411_vm0, %v389_v14 }
  0x60   : > { %1026 = vmatpush.xpose.msk.msra.mxu2 %vm411_vm0, %v389_v14  ;;  %1027 = vmatpush.xpose.msk.msra.mxu3 %vm411_vm0, %v389_v14 }
  0x63   : > { %980 = vmatpush.xpose.msk.msra.mxu0 %vm411_vm0, %v388_v15  ;;  %1028 = vmatpush.xpose.msk.msra.mxu1 %vm411_vm0, %v388_v15 }
  0x64   : > { %1029 = vmatpush.xpose.msk.msra.mxu2 %vm411_vm0, %v388_v15  ;;  %1030 = vmatpush.xpose.msk.msra.mxu3 %vm411_vm0, %v388_v15 }
  0x67   : > { %981 = vmatpush.xpose.msk.msra.mxu0 %vm411_vm0, %v387_v16  ;;  %1031 = vmatpush.xpose.msk.msra.mxu1 %vm411_vm0, %v387_v16 }
  0x68   : > { %1032 = vmatpush.xpose.msk.msra.mxu2 %vm411_vm0, %v387_v16  ;;  %1033 = vmatpush.xpose.msk.msra.mxu3 %vm411_vm0, %v387_v16 }
  0x6b   : > { %982 = vmatpush.xpose.msk.msra.mxu0 %vm411_vm0, %v386_v17  ;;  %1034 = vmatpush.xpose.msk.msra.mxu1 %vm411_vm0, %v386_v17 }
  0x6c   : > { %1035 = vmatpush.xpose.msk.msra.mxu2 %vm411_vm0, %v386_v17  ;;  %1036 = vmatpush.xpose.msk.msra.mxu3 %vm411_vm0, %v386_v17  ;;  %v702_v17 = vadd.f32 %v999_v12, %v694_v13 }
  0x6e   : > { %710 = vst [vmem:[#allocation4 + $0x20] sm:$0xff] %v702_v17 }
  0x6f   : > { %983 = vmatpush.xpose.msk.msra.mxu0 %vm411_vm0, %v385_v18  ;;  %1037 = vmatpush.xpose.msk.msra.mxu1 %vm411_vm0, %v385_v18 }
  0x70   : > { %1038 = vmatpush.xpose.msk.msra.mxu2 %vm411_vm0, %v385_v18  ;;  %1039 = vmatpush.xpose.msk.msra.mxu3 %vm411_vm0, %v385_v18  ;;  %v1503_v18 = vld [vmem:[%s1326_s26 + $0x18] sm:$0xff] }
  0x71   : > { %vm616_vm6 = vcmp.gt.f32.partialorder %v1503_v18, 0.0 }
  0x73   : > { %984 = vmatpush.xpose.msk.msra.mxu0 %vm411_vm0, %v384_v19  ;;  %1040 = vmatpush.xpose.msk.msra.mxu1 %vm411_vm0, %v384_v19 }
  0x74   : > { %1041 = vmatpush.xpose.msk.msra.mxu2 %vm411_vm0, %v384_v19  ;;  %1042 = vmatpush.xpose.msk.msra.mxu3 %vm411_vm0, %v384_v19 }
  0x77   : > { %985 = vmatpush.xpose.msk.msra.mxu0 %vm411_vm0, %v383_v20  ;;  %1043 = vmatpush.xpose.msk.msra.mxu1 %vm411_vm0, %v383_v20 }
  0x78   : > { %1044 = vmatpush.xpose.msk.msra.mxu2 %vm411_vm0, %v383_v20  ;;  %1045 = vmatpush.xpose.msk.msra.mxu3 %vm411_vm0, %v383_v20 }
  0x7b   : > { %986 = vmatpush.xpose.msk.msra.mxu0 %vm411_vm0, %v382_v21  ;;  %1046 = vmatpush.xpose.msk.msra.mxu1 %vm411_vm0, %v382_v21 }
  0x7c   : > { %1047 = vmatpush.xpose.msk.msra.mxu2 %vm411_vm0, %v382_v21  ;;  %1048 = vmatpush.xpose.msk.msra.mxu3 %vm411_vm0, %v382_v21 }
  0x7f   : > { %987 = vmatpush.xpose.msk.msra.mxu0 %vm411_vm0, %v381_v22  ;;  %1049 = vmatpush.xpose.msk.msra.mxu1 %vm411_vm0, %v381_v22 }
  0x80   : > { %1050 = vmatpush.xpose.msk.msra.mxu2 %vm411_vm0, %v381_v22  ;;  %1051 = vmatpush.xpose.msk.msra.mxu3 %vm411_vm0, %v381_v22  ;;  %v696_v22 = vld [vmem:[#allocation4 + $0x10] sm:$0xff] }
  0x83   : > { %988 = vmatpush.xpose.msk.msra.mxu0 %vm411_vm0, %v380_v23  ;;  %1052 = vmatpush.xpose.msk.msra.mxu1 %vm411_vm0, %v380_v23 }
  0x84   : > { %1053 = vmatpush.xpose.msk.msra.mxu2 %vm411_vm0, %v380_v23  ;;  %1054 = vmatpush.xpose.msk.msra.mxu3 %vm411_vm0, %v380_v23 }
  0x87   : > { %989 = vmatpush.xpose.msk.msra.mxu0 %vm411_vm0, %v379_v26  ;;  %1055 = vmatpush.xpose.msk.msra.mxu1 %vm411_vm0, %v379_v26 }
  0x88   : > { %1056 = vmatpush.xpose.msk.msra.mxu2 %vm411_vm0, %v379_v26  ;;  %1057 = vmatpush.xpose.msk.msra.mxu3 %vm411_vm0, %v379_v26 }
  0x8a   : > { %990 = vmatmul.msk.f32.vlgmr.msra.gmra.mxu0 %vm411_vm0, %v403_v29  ;;  %992 = vmatmul.msk.f32.vlgmr.msra.gmra.mxu1 %vm411_vm0, %v405_v30  ;;  %v1001_v30 = vsel %vm616_vm6, 1.0, %v1213_v42 }
  0x8b   : > { %994 = vmatmul.msk.f32.vlgmr.msra.gmra.mxu2 %vm411_vm0, %v407_v31  ;;  %996 = vmatmul.msk.f32.vlgmr.msra.gmra.mxu3 %vm411_vm0, %v409_v32 }
  0x92   : > { %991 = vmatmul.msk.f32.gmra.mxu0 %vm411_vm0, %v404_v37  ;;  %993 = vmatmul.msk.f32.gmra.mxu1 %vm411_vm0, %v406_v38  ;;  %v704_v37 = vadd.f32 %v1001_v30, %v696_v22  ;;  %v669_v22 = vld [vmem:[#allocation3] sm:$0xff]  ;;  %v671_v30 = vld [vmem:[#allocation3 + $0x10] sm:$0xff] }
  0x93   : > { %995 = vmatmul.msk.f32.gmra.mxu2 %vm411_vm0, %v408_v39  ;;  %997 = vmatmul.msk.f32.gmra.mxu3 %vm411_vm0, %v410_v40  ;;  %v1514_v40 = vld [vmem:[%s1326_s26 + $0x28] sm:$0xff] }
  0x94   : > { %712 = vst [vmem:[#allocation4 + $0x10] sm:$0xff] %v704_v37  ;;  %vm618_vm7 = vcmp.gt.f32.partialorder %v1514_v40, 0.0 }
  0x95   : > { %v1003_v50 = vsel %vm618_vm7, 1.0, %v1213_v42 }
 0x107   : > { %v1460_v45 = vpop.f32.mrf.mxu0  ;;  %v1462_v47 = vpop.f32.mrf.mxu1 }
 0x108   : > { %v525_v49 = vand.u32 2147483647, %v1460_v45  ;;  %v527_v51 = vand.u32 2147483647, %v1462_v47  ;;  %v581_v9 = vmax.f32 %v1460_v45, 0.0  ;;  %v583_v12 = vmax.f32 %v1462_v47, 0.0 }
 0x10a   : > { %v533_v53 = vsub.f32 0.0, %v525_v49  ;;  %v535_v55 = vsub.f32 0.0, %v527_v51  ;;  %v1523_v51 = vld [vmem:[%s1326_s26 + $0x38] sm:$0xff] }
 0x10b   : > { %vm620_vm8 = vcmp.gt.f32.partialorder %v1523_v51, 0.0 }
 0x10c   : > { %v541_v57 = vmul.f32 1.442695, %v533_v53  ;;  %v545_v59 = vmul.f32 1.442695, %v535_v55  ;;  %v706_v53 = vadd.f32 %v1003_v50, %v698_v46 }
 0x10e   : > { %1124 = vpow2.f32 %v541_v57  ;;  %v1480_v61 = vpop.f32.mrf.mxu2  ;;  %v1482_v63 = vpop.f32.mrf.mxu3  ;;  %714 = vst [vmem:[#allocation4 + $0x30] sm:$0xff] %v706_v53 }
 0x10f   : > { %1126 = vpow2.f32 %v545_v59  ;;  %v529_v1 = vand.u32 2147483647, %v1480_v61  ;;  %v1488_v2 = vpop.f32.mrf.mxu0  ;;  %v1490_v3 = vpop.f32.mrf.mxu1  ;;  %v531_v5 = vand.u32 2147483647, %v1482_v63  ;;  %v1005_v59 = vsel %vm620_vm8, 1.0, %v1213_v42 }
 0x110   : > { %v526_v10 = vand.u32 2147483647, %v1488_v2  ;;  %v528_v14 = vand.u32 2147483647, %v1490_v3  ;;  %v585_v37 = vmax.f32 %v1480_v61, 0.0 }
 0x111   : > { %v537_v8 = vsub.f32 0.0, %v529_v1  ;;  %v539_v11 = vsub.f32 0.0, %v531_v5  ;;  %v708_v1 = vadd.f32 %v1005_v59, %v700_v52 }
 0x112   : > { %v534_v16 = vsub.f32 0.0, %v526_v10  ;;  %v536_v21 = vsub.f32 0.0, %v528_v14  ;;  %v597_v14 = vmul.f32 %v1460_v45, %v1450_v41 }
 0x113   : > { %v549_v15 = vmul.f32 1.442695, %v537_v8  ;;  %v553_v20 = vmul.f32 1.442695, %v539_v11  ;;  %716 = vst [vmem:[#allocation4] sm:$0xff] %v708_v1 }
 0x114   : > { %v1125_v19 = vpop.eup %1124  ;;  %v543_v29 = vmul.f32 1.442695, %v534_v16  ;;  %v547_v32 = vmul.f32 1.442695, %v536_v21  ;;  %v645_v16 = vld [vmem:[#allocation2 + $0x30] sm:$0xff] }
 0x115   : > { %v1127_v23 = vpop.eup %1126  ;;  %v557_v26 = vadd.f32 1.0, %v1125_v19  ;;  %1128 = vpow2.f32 %v549_v15  ;;  %v599_v19 = vmul.f32 %v1462_v47, %v1457_v44 }
 0x116   : > { %v559_v31 = vadd.f32 1.0, %v1127_v23  ;;  %1130 = vpow2.f32 %v553_v20  ;;  %v1509_v38 = vpop.f32.mrf.mxu2  ;;  %v1511_v39 = vpop.f32.mrf.mxu3  ;;  %v647_v23 = vld [vmem:[#allocation2 + $0x18] sm:$0xff] }
 0x117   : > { %1132 = vlog2.f32 %v557_v26  ;;  %v530_v43 = vand.u32 2147483647, %v1509_v38  ;;  %v532_v48 = vand.u32 2147483647, %v1511_v39 }
 0x118   : > { %1134 = vlog2.f32 %v559_v31 }
 0x119   : > { %1136 = vpow2.f32 %v543_v29  ;;  %v538_v49 = vsub.f32 0.0, %v530_v43  ;;  %v540_v54 = vsub.f32 0.0, %v532_v48 }
 0x11a   : > { %1138 = vpow2.f32 %v547_v32 }
 0x11b   : > { %v1129_v55 = vpop.eup %1128  ;;  %v551_v57 = vmul.f32 1.442695, %v538_v49  ;;  %v555_v0 = vmul.f32 1.442695, %v540_v54 }
 0x11c   : > { %v1131_v60 = vpop.eup %1130  ;;  %v561_v62 = vadd.f32 1.0, %v1129_v55  ;;  %v587_v55 = vmax.f32 %v1482_v63, 0.0 }
 0x11d   : > { %v1133_v4 = vpop.eup %1132  ;;  %v563_v5 = vadd.f32 1.0, %v1131_v60  ;;  %1140 = vpow2.f32 %v551_v57  ;;  %v601_v57 = vmul.f32 %v1480_v61, %v1470_v56  ;;  %v598_v61 = vmul.f32 %v1488_v2, %v1494_v7 }
 0x11e   : > { %v1135_v6 = vpop.eup %1134  ;;  %v566_v8 = vmul.f32 0.6931472, %v1133_v4  ;;  %1142 = vlog2.f32 %v561_v62  ;;  %v649_v62 = vld [vmem:[#allocation2 + $0x8] sm:$0xff]  ;;  %v604_v7 = vmul.f32 %v1511_v39, %v1523_v51 }
 0x11f   : > { %v1137_v10 = vpop.eup %1136  ;;  %v570_v11 = vmul.f32 0.6931472, %v1135_v6  ;;  %1144 = vlog2.f32 %v563_v5  ;;  %v673_v5 = vld [vmem:[#allocation3 + $0x28] sm:$0xff] }
 0x120   : > { %v1139_v42 = vpop.eup %1138  ;;  %v589_v13 = vadd.f32 %v581_v9, %v566_v8  ;;  %v558_v15 = vadd.f32 1.0, %v1137_v10  ;;  %1146 = vpow2.f32 %v555_v0  ;;  %v603_v0 = vmul.f32 %v1482_v63, %v1474_v58  ;;  %v651_v6 = vld [vmem:[#allocation2 + $0x28] sm:$0xff] }
 0x121   : > { %v591_v17 = vadd.f32 %v583_v12, %v570_v11  ;;  %v560_v20 = vadd.f32 1.0, %v1139_v42  ;;  %v582_v9 = vmax.f32 %v1488_v2, 0.0  ;;  %v675_v11 = vld [vmem:[#allocation3 + $0x30] sm:$0xff]  ;;  %v584_v42 = vmax.f32 %v1490_v3, 0.0 }
 0x122   : > { %v605_v21 = vsub.f32 %v589_v13, %v597_v14  ;;  %1148 = vlog2.f32 %v558_v15  ;;  %v600_v15 = vmul.f32 %v1490_v3, %v1503_v18  ;;  %v602_v3 = vmul.f32 %v1509_v38, %v1514_v40 }
 0x123   : > { %v1141_v26 = vpop.eup %1140  ;;  %v607_v29 = vsub.f32 %v591_v17, %v599_v19  ;;  %1150 = vlog2.f32 %v560_v20 }
 0x124   : > { %v1143_v31 = vpop.eup %1142  ;;  %v621_v45 = vsel %vm613_vm1, %v605_v21, 0.0  ;;  %v653_v32 = vadd.f32 %v645_v16, %v605_v21  ;;  %v562_v43 = vadd.f32 1.0, %v1141_v26  ;;  %v646_v21 = vld [vmem:[#allocation2] sm:$0xff]  ;;  %v670_v26 = vld [vmem:[#allocation3 + $0x18] sm:$0xff] }
 0x125   : > { %v1145_v46 = vpop.eup %1144  ;;  %v677_v48 = vadd.f32 %v669_v22, %v621_v45  ;;  %v623_v47 = vsel %vm615_vm2, %v607_v29, 0.0  ;;  %v655_v49 = vadd.f32 %v647_v23, %v607_v29  ;;  %v574_v50 = vmul.f32 0.6931472, %v1143_v31  ;;  %v648_v29 = vld [vmem:[#allocation2 + $0x10] sm:$0xff]  ;;  %v672_v45 = vld [vmem:[#allocation3 + $0x20] sm:$0xff] }
 0x126   : > { %v1147_v52 = vpop.eup %1146  ;;  %661 = vst [vmem:[#allocation2 + $0x30] sm:$0xff] %v653_v32  ;;  %v679_v53 = vadd.f32 %v671_v30, %v623_v47  ;;  %v578_v54 = vmul.f32 0.6931472, %v1145_v46  ;;  %1152 = vlog2.f32 %v562_v43  ;;  %v586_v30 = vmax.f32 %v1509_v38, 0.0 }
 0x127   : > { %685 = vst [vmem:[#allocation3] sm:$0xff] %v677_v48  ;;  %v593_v41 = vadd.f32 %v585_v37, %v574_v50  ;;  %v564_v59 = vadd.f32 1.0, %v1147_v52  ;;  %v588_v46 = vmax.f32 %v1511_v39, 0.0  ;;  %v650_v50 = vld [vmem:[#allocation2 + $0x20] sm:$0xff] }
 0x128   : > { %v1149_v60 = vpop.eup %1148  ;;  %663 = vst [vmem:[#allocation2 + $0x18] sm:$0xff] %v655_v49  ;;  %v595_v44 = vadd.f32 %v587_v55, %v578_v54  ;;  %v674_v54 = vld [vmem:[#allocation3 + $0x8] sm:$0xff] }
 0x129   : > { %v1151_v1 = vpop.eup %1150  ;;  %687 = vst [vmem:[#allocation3 + $0x10] sm:$0xff] %v679_v53  ;;  %v609_v4 = vsub.f32 %v593_v41, %v601_v57  ;;  %v568_v8 = vmul.f32 0.6931472, %v1149_v60  ;;  %1154 = vlog2.f32 %v564_v59  ;;  %v652_v59 = vld [vmem:[#allocation2 + $0x38] sm:$0xff] }
 0x12a   : > { %v611_v10 = vsub.f32 %v595_v44, %v603_v0  ;;  %v572_v12 = vmul.f32 0.6931472, %v1151_v1 }
 0x12b   : > { %v625_v63 = vsel %vm617_vm3, %v609_v4, 0.0  ;;  %v657_v13 = vadd.f32 %v649_v62, %v609_v4  ;;  %v590_v14 = vadd.f32 %v582_v9, %v568_v8  ;;  %v676_v62 = vld [vmem:[#allocation3 + $0x38] sm:$0xff] }
 0x12c   : > { %v1153_v16 = vpop.eup %1152  ;;  %v681_v17 = vadd.f32 %v673_v5, %v625_v63  ;;  %v627_v19 = vsel %vm619_vm4, %v611_v10, 0.0  ;;  %v659_v20 = vadd.f32 %v651_v6, %v611_v10  ;;  %v592_v22 = vadd.f32 %v584_v42, %v572_v12 }
 0x12d   : > { %665 = vst [vmem:[#allocation2 + $0x8] sm:$0xff] %v657_v13  ;;  %v683_v2 = vadd.f32 %v675_v11, %v627_v19  ;;  %v606_v23 = vsub.f32 %v590_v14, %v598_v61  ;;  %v576_v56 = vmul.f32 0.6931472, %v1153_v16 }
 0x12e   : > { %689 = vst [vmem:[#allocation3 + $0x28] sm:$0xff] %v681_v17  ;;  %v608_v31 = vsub.f32 %v592_v22, %v600_v15 }
 0x12f   : > { %v1155_v32 = vpop.eup %1154  ;;  %667 = vst [vmem:[#allocation2 + $0x28] sm:$0xff] %v659_v20  ;;  %v622_v58 = vsel %vm614_vm5, %v606_v23, 0.0  ;;  %v654_v37 = vadd.f32 %v646_v21, %v606_v23  ;;  %v594_v43 = vadd.f32 %v586_v30, %v576_v56 }
 0x130   : > { %691 = vst [vmem:[#allocation3 + $0x30] sm:$0xff] %v683_v2  ;;  %v678_v48 = vadd.f32 %v670_v26, %v622_v58  ;;  %v624_v47 = vsel %vm616_vm6, %v608_v31, 0.0  ;;  %v656_v49 = vadd.f32 %v648_v29, %v608_v31  ;;  %v580_v52 = vmul.f32 0.6931472, %v1155_v32 }
 0x131   : > { %662 = vst [vmem:[#allocation2] sm:$0xff] %v654_v37  ;;  %v680_v53 = vadd.f32 %v672_v45, %v624_v47  ;;  %v610_v38 = vsub.f32 %v594_v43, %v602_v3 }
 0x132   : > { %686 = vst [vmem:[#allocation3 + $0x18] sm:$0xff] %v678_v48  ;;  %v596_v55 = vadd.f32 %v588_v46, %v580_v52 }
 0x133   : > { %664 = vst [vmem:[#allocation2 + $0x10] sm:$0xff] %v656_v49  ;;  %v626_v41 = vsel %vm618_vm7, %v610_v38, 0.0  ;;  %v658_v57 = vadd.f32 %v650_v50, %v610_v38 }
 0x134   : > { %688 = vst [vmem:[#allocation3 + $0x20] sm:$0xff] %v680_v53  ;;  %v682_v18 = vadd.f32 %v674_v54, %v626_v41  ;;  %v612_v60 = vsub.f32 %v596_v55, %v604_v7 }
 0x135   : > { %666 = vst [vmem:[#allocation2 + $0x20] sm:$0xff] %v658_v57  ;;  %720 = sbr.rel (%p1006_p0) target bundleno = 525 (0x20d), region = 82 }
 0x136   : > { %690 = vst [vmem:[#allocation3 + $0x8] sm:$0xff] %v682_v18  ;;  %v628_v44 = vsel %vm620_vm8, %v612_v60, 0.0  ;;  %v660_v0 = vadd.f32 %v652_v59, %v612_v60 }
 0x137   : > { %v684_v1 = vadd.f32 %v676_v62, %v628_v44 }
 0x138   : > { %668 = vst [vmem:[#allocation2 + $0x38] sm:$0xff] %v660_v0 }
 0x139   : > { %692 = vst [vmem:[#allocation3 + $0x38] sm:$0xff] %v684_v1 }
 0x13a   : > { %v769_v39 = vld [vmem:[#allocation4 + $0x28] sm:$0xff]  ;;  %v770_v40 = vld [vmem:[#allocation4 + $0x20] sm:$0xff]  ;;  %v771_v4 = vld [vmem:[#allocation4 + $0x38] sm:$0xff] }
 0x13b   : > { %v777_v5 = vadd.f32 %v770_v40, %v769_v39  ;;  %v772_v6 = vld [vmem:[#allocation4 + $0x10] sm:$0xff]  ;;  %v722_v9 = vld [vmem:[#allocation2] sm:$0xff]  ;;  %v723_v10 = vld [vmem:[#allocation2 + $0x18] sm:$0xff] }
 0x13c   : > { %v721_v8 = vld [vmem:[#allocation2 + $0x30] sm:$0xff]  ;;  %v773_v11 = vld [vmem:[#allocation4 + $0x8] sm:$0xff]  ;;  %v793_v13 = vld [vmem:[%s1313_s6] sm:$0xff] }
 0x13d   : > { %v778_v51 = vadd.f32 %v777_v5, %v771_v4  ;;  %v774_v61 = vld [vmem:[#allocation4 + $0x30] sm:$0xff]  ;;  %v729_v12 = vadd.f32 %v722_v9, %v721_v8  ;;  %v794_v14 = vld [vmem:[%s1313_s6 + $0x8] sm:$0xff]  ;;  %v796_v17 = vld [vmem:[%s1313_s6 + $0x18] sm:$0xff]  ;;  %v801_v20 = vmul.f32 %v793_v13, %v1403_v24 }
 0x13e   : > { %v724_v63 = vld [vmem:[#allocation2 + $0x10] sm:$0xff]  ;;  %v797_v19 = vld [vmem:[%s1313_s6 + $0x20] sm:$0xff]  ;;  %v802_v21 = vmul.f32 %v794_v14, %v1430_v33  ;;  %v725_v2 = vld [vmem:[#allocation2 + $0x8] sm:$0xff]  ;;  %v804_v26 = vmul.f32 %v796_v17, %v1433_v34 }
 0x13f   : > { %v779_v42 = vadd.f32 %v778_v51, %v772_v6  ;;  %v730_v15 = vadd.f32 %v729_v12, %v723_v10  ;;  %v795_v16 = vld [vmem:[%s1313_s6 + $0x10] sm:$0xff]  ;;  %v775_v29 = vld [vmem:[#allocation4 + $0x18] sm:$0xff]  ;;  %v798_v30 = vld [vmem:[%s1313_s6 + $0x28] sm:$0xff]  ;;  %v805_v31 = vmul.f32 %v797_v19, %v1412_v27  ;;  %v809_v32 = vsel %vm411_vm0, %v801_v20, 0.0 }
 0x140   : > { %v803_v23 = vmul.f32 %v795_v16, %v1406_v25  ;;  %v726_v3 = vld [vmem:[#allocation2 + $0x20] sm:$0xff]  ;;  %v810_v24 = vsel %vm411_vm0, %v802_v21, 0.0  ;;  %v746_v37 = vld [vmem:[#allocation3 + $0x18] sm:$0xff]  ;;  %v799_v46 = vld [vmem:[%s1313_s6 + $0x30] sm:$0xff]  ;;  %v806_v49 = vmul.f32 %v798_v30, %v1436_v35  ;;  %v814_v27 = vsel %vm411_vm0, %v804_v26, 0.0 }
 0x141   : > { %v780_v22 = vadd.f32 %v779_v42, %v773_v11  ;;  %v731_v56 = vadd.f32 %v730_v15, %v724_v63  ;;  %v745_v58 = vld [vmem:[#allocation3] sm:$0xff]  ;;  %v811_v34 = vadd.f32 %v810_v24, %v809_v32  ;;  %v727_v47 = vld [vmem:[#allocation2 + $0x28] sm:$0xff]  ;;  %v747_v50 = vld [vmem:[#allocation3 + $0x10] sm:$0xff]  ;;  %v807_v41 = vmul.f32 %v799_v46, %v1415_v28 }
 0x142   : > { %v812_v33 = vsel %vm411_vm0, %v803_v23, 0.0  ;;  %v776_v43 = vld [vmem:[#allocation4] sm:$0xff]  ;;  %v800_v53 = vld [vmem:[%s1313_s6 + $0x38] sm:$0xff]  ;;  %v753_v54 = vadd.f32 %v746_v37, %v745_v58  ;;  %v816_v57 = vsel %vm411_vm0, %v805_v31, 0.0  ;;  %v818_v44 = vsel %vm411_vm0, %v806_v49, 0.0  ;;  %v749_v0 = vld [vmem:[#allocation3 + $0x28] sm:$0xff] }
 0x143   : > { %v781_v45 = vadd.f32 %v780_v22, %v774_v61  ;;  %v732_v25 = vadd.f32 %v731_v56, %v725_v2  ;;  %v813_v38 = vadd.f32 %v812_v33, %v811_v34  ;;  %v728_v7 = vld [vmem:[#allocation2 + $0x38] sm:$0xff]  ;;  %v748_v59 = vld [vmem:[#allocation3 + $0x20] sm:$0xff]  ;;  %v808_v35 = vmul.f32 %v800_v53, %v1439_v36  ;;  %v750_v5 = vld [vmem:[#allocation3 + $0x8] sm:$0xff] }
 0x144   : > { %v754_v62 = vadd.f32 %v753_v54, %v747_v50  ;;  %v820_v4 = vsel %vm411_vm0, %v807_v41, 0.0  ;;  %v751_v51 = vld [vmem:[#allocation3 + $0x30] sm:$0xff]  ;;  %v752_v11 = vld [vmem:[#allocation3 + $0x38] sm:$0xff]  ;;  %v833_v34 = vlaneseq }
 0x145   : > { %v782_v48 = vadd.f32 %v781_v45, %v775_v29  ;;  %v733_v52 = vadd.f32 %v732_v25, %v726_v3  ;;  %v815_v60 = vadd.f32 %v814_v27, %v813_v38  ;;  %v822_v8 = vsel %vm411_vm0, %v808_v35, 0.0 }
 0x146   : > { %v755_v40 = vadd.f32 %v754_v62, %v748_v59 }
 0x147   : > { %v783_v55 = vadd.f32 %v782_v48, %v776_v43  ;;  %v734_v18 = vadd.f32 %v733_v52, %v727_v47  ;;  %v817_v39 = vadd.f32 %v816_v57, %v815_v60  ;;  %v834_v48 = vshrl.u32 %v833_v34, 7 }
 0x148   : > { %v756_v6 = vadd.f32 %v755_v40, %v749_v0 }
 0x149   : > { %784 = vadd.xlane.f32.xlu1 %v783_v55  ;;  %v735_v1 = vadd.f32 %v734_v18, %v728_v7  ;;  %v819_v28 = vadd.f32 %v818_v44, %v817_v39  ;;  %vm838_vm9 = vcmp.eq.s32.totalorder %v834_v48, 3  ;;  %vm837_vm10 = vcmp.eq.s32.totalorder %v834_v48, 2 }
 0x14a   : > { %v757_v10 = vadd.f32 %v756_v6, %v750_v5  ;;  %vm836_vm11 = vcmp.eq.s32.totalorder %v834_v48, 1  ;;  %vm835_vm12 = vcmp.eq.s32.totalorder %v834_v48, 0 }
 0x14b   : > { %736 = vadd.xlane.f32.xlu0 %v735_v1  ;;  %v821_v9 = vadd.f32 %v820_v4, %v819_v28 }
 0x14c   : > { %v758_v36 = vadd.f32 %v757_v10, %v751_v51 }
 0x14d   : > { %v823_v61 = vadd.f32 %v822_v8, %v821_v9 }
 0x14e   : > { %v759_v12 = vadd.f32 %v758_v36, %v752_v11 }
 0x151   : > { %824 = vadd.xlane.f32.xlu1 %v823_v61 }
 0x153   : > { %760 = vadd.xlane.f32.xlu0 %v759_v12 }
 0x1bc   : > { %v785_v42 = vpop.xlane.xlu1 %784 }
 0x1bd   : > { %v786_v63 = vrot.slane %v785_v42, 4 }
 0x1be   : > { %v737_v13 = vpop.xlane.xlu0 %736 }
 0x1bf   : > { %v738_v14 = vrot.slane %v737_v13, 4  ;;  %v787_v16 = vadd.f32 %v786_v63, %v785_v42 }
 0x1c1   : > { %v739_v15 = vadd.f32 %v738_v14, %v737_v13  ;;  %v788_v22 = vrot.slane %v787_v16, 2 }
 0x1c3   : > { %v740_v17 = vrot.slane %v739_v15, 2  ;;  %v789_v45 = vadd.f32 %v788_v22, %v787_v16 }
 0x1c4   : > { %v825_v19 = vpop.xlane.xlu1 %824 }
 0x1c5   : > { %v826_v20 = vrot.slane %v825_v19, 4  ;;  %v741_v21 = vadd.f32 %v740_v17, %v739_v15  ;;  %v790_v58 = vrot.slane %v789_v45, 1 }
 0x1c6   : > { %v761_v2 = vpop.xlane.xlu0 %760 }
 0x1c7   : > { %v827_v23 = vadd.f32 %v826_v20, %v825_v19  ;;  %v762_v26 = vrot.slane %v761_v2, 4  ;;  %v742_v29 = vrot.slane %v741_v21, 1  ;;  %v791_v46 = vadd.f32 %v790_v58, %v789_v45 }
 0x1c9   : > { %v828_v56 = vrot.slane %v827_v23, 2  ;;  %v763_v30 = vadd.f32 %v762_v26, %v761_v2  ;;  %v743_v31 = vadd.f32 %v742_v29, %v741_v21 }
 0x1cb   : > { %v829_v3 = vadd.f32 %v828_v56, %v827_v23  ;;  %v764_v32 = vrot.slane %v763_v30, 2  ;;  %1058 = vpush %v743_v31 }
 0x1cd   : > { %v765_v24 = vadd.f32 %v764_v32, %v763_v30  ;;  %v830_v33 = vrot.slane %v829_v3, 1 }
 0x1cf   : > { %v766_v37 = vrot.slane %v765_v24, 1  ;;  %v831_v25 = vadd.f32 %v830_v33, %v829_v3 }
 0x1d1   : > { %v767_v43 = vadd.f32 %v766_v37, %v765_v24 }
 0x1d3   : > { %1060 = vpush %v767_v43 }
 0x1d4   : > { %1062 = vpush %v791_v46 }
 0x1d5   : > { %1064 = vpush %v831_v25 }
 0x1fc   : > { %s1059_s17 = spop %1058 }
 0x1fd   : > { %v845_v53 = vstv %s1059_s17 }
 0x204   : > { %s1061_s18 = spop %1060 }
 0x205   : > { %s1063_s14 = spop %1062  ;;  %v843_v50 = vstv %s1061_s18 }
 0x206   : > { %v841_v47 = vstv %s1063_s14  ;;  %s1065_s24 = spop %1064 }
 0x207   : > { %v839_v49 = vstv %s1065_s24 }
 0x208   : > { %v840_v27 = vsel %vm838_vm9, %v839_v49, 0.0 }
 0x209   : > { %v842_v52 = vsel %vm837_vm10, %v841_v47, %v840_v27 }
 0x20a   : > { %v844_v38 = vsel %vm836_vm11, %v843_v50, %v842_v52 }
 0x20b   : > { %v846_v54 = vsel %vm835_vm12, %v845_v53, %v844_v38 }
 0x20c   : > { %847 = vst [vmem:[%s1324_s13] sm:$0xff] %v846_v54 }
 0x20d PF: > { %s14_s21 = sadd.s32 1, %s1210_s21   ;;  %s1621_s15 = smov %s1190_s16 }
 0x20e   : > { %p11_p1 = scmp.ge.s32.totalorder %s14_s21, 10   ;;  %s1622_s16 = smov %s1290_s28 }
 0x20f   : > { %s1623_s17 = smov %s1202_s19  ;;  %s1624_s18 = smov %s1206_s20 }
 0x210   : > { %s1625_s19 = smov %s1628_s22  ;;  %s1626_s20 = smov %s1632_s23 }
 0x211   :  { %13 = sbr.rel (!%p11_p1) target bundleno = 4 (0x4), region = 126 }

</bundles_post_ra>
